<compile_context>
chip_gen: v7x
topology: tpu7x:2x2x1
jax: 0.10.0
libtpu: 0.0.40
codegen_flags: <defaults>
</compile_context>

<pallas_src>
import functools

import jax
import jax.numpy as jnp
from jax import lax
from jax.experimental import pallas as pl
from jax.experimental.pallas import tpu as pltpu


def _ceil_div(a, b):
    return -(-a // b)


def _round_up(a, b):
    return _ceil_div(a, b) * b


def _mha_map_kernel(q_ref, kp_ref, wq_ref, bq_ref, out_ref, *,
                    num_heads, head_dim, hw_valid):
    # q_ref  : (1, TQ, D)       bf16
    # kp_ref : (1, HID, HWp)    bf16  -- k projection, precomputed in wrapper
    # wq_ref : (D, HID)         bf16  -- pre-scaled by normalize_fact
    # bq_ref : (1, HID)         f32   -- pre-scaled by normalize_fact
    # out_ref: (1, TQ, N*HWp)   f32   -- softmax over the joint (N, H, W) axis
    tq = q_ref.shape[1]
    hwp = kp_ref.shape[2]
    padded = hwp > hw_valid            # static
    n_main = hwp - 128 if padded else hwp

    # q projection on the MXU (bf16 operands, f32 accumulation), then one
    # transpose so the per-head slices below are sublane (row) slices.
    qp = jnp.dot(q_ref[0], wq_ref[...],
                 preferred_element_type=jnp.float32) + bq_ref[...]   # (TQ, HID)
    qpT = jnp.transpose(qp)                                          # (HID, TQ)

    if padded:
        # Mask only the trailing 128-lane block (the only place pad can live).
        col = lax.broadcasted_iota(jnp.int32, (1, 128), 1)
        tail_valid = (col + n_main) < hw_valid                        # (1, 128)

    # ---- Pass 1: per-head logits -> out_ref (in place), flash-style running
    #      max and rescaled denominator over the joint (heads, H, W) axis.
    m = jnp.full((tq, 1), -jnp.inf, dtype=jnp.float32)
    denom = jnp.zeros((tq, 1), dtype=jnp.float32)
    for n in range(num_heads):
        lo = n * head_dim
        base = n * hwp
        qh = qpT[lo:lo + head_dim, :].astype(jnp.bfloat16)            # (c, TQ)
        kh = kp_ref[0, lo:lo + head_dim, :]                           # (c, HWp)
        # logits = qh^T @ kh : contraction on dim 0 of both operands (MXU).
        s = lax.dot_general(qh, kh, (((0,), (0,)), ((), ())),
                            preferred_element_type=jnp.float32)       # (TQ, HWp)
        if padded:
            s_tail = jnp.where(tail_valid, s[:, n_main:], jnp.float32(-1e30))
            if n_main:
                s_main = s[:, :n_main]
                out_ref[0, :, base:base + n_main] = s_main
            out_ref[0, :, base + n_main:base + hwp] = s_tail
            blk_max = jnp.max(s_tail, axis=-1, keepdims=True)
            if n_main:
                blk_max = jnp.maximum(
                    blk_max, jnp.max(s_main, axis=-1, keepdims=True))
            m_new = jnp.maximum(m, blk_max)
            blk_sum = jnp.sum(jnp.exp(s_tail - m_new), axis=-1, keepdims=True)
            if n_main:
                blk_sum = blk_sum + jnp.sum(jnp.exp(s_main - m_new),
                                            axis=-1, keepdims=True)
        else:
            out_ref[0, :, base:base + hwp] = s
            blk_max = jnp.max(s, axis=-1, keepdims=True)
            m_new = jnp.maximum(m, blk_max)
            blk_sum = jnp.sum(jnp.exp(s - m_new), axis=-1, keepdims=True)
        denom = denom * jnp.exp(m - m_new) + blk_sum
        m = m_new

    # ---- Pass 2: fused exp + normalize, in place.  Exact reciprocal (a single
    #      (TQ, 1) divide) so softmax rows sum to 1 to f32 precision.
    inv = pl.reciprocal(denom, approx=False)
    for n in range(num_heads):
        base = n * hwp
        out_ref[0, :, base:base + hwp] = (
            jnp.exp(out_ref[0, :, base:base + hwp] - m) * inv)


def mh_attention_map(q, k, wq, bq, wk, bk, num_heads):
    """q: (B, Q, D) f32, k: (B, D, H, W) f32 (NCHW, like PyTorch).

    Returns softmax attention maps of shape (B, Q, num_heads, H, W)."""
    B, Q, D = q.shape
    _, Dk, H, W = k.shape
    assert Dk == D
    HID = wq.shape[1]
    head_dim = HID // num_heads
    HW = H * W
    norm_fact = float(HID / num_heads) ** (-0.5)

    # Fold normalize_fact into the q projection (removes the per-head scale).
    wq_s = (wq * norm_fact).astype(jnp.bfloat16)                     # (D, HID)
    bq_s = (bq * norm_fact).reshape(1, HID).astype(jnp.float32)

    # Hoist the k projection (1x1 conv) out of the grid loop: it is invariant
    # along the Q-tile axis, so compute it once per batch element here (tiny
    # f32 matmul in XLA), pad H*W to a lane multiple, and hand the kernel a
    # (B, HID, HWp) bf16 tensor.  NCHW -> (B, D, HW) is a free reshape.
    k_flat = k.reshape(B, D, HW).astype(jnp.float32)
    kp = jnp.einsum('dh,bdx->bhx', wk.astype(jnp.float32), k_flat) \
        + bk.reshape(1, HID, 1).astype(jnp.float32)                  # (B, HID, HW)
    HWp = _round_up(HW, 128)
    if HWp != HW:
        kp = jnp.pad(kp, ((0, 0), (0, 0), (0, HWp - HW)))            # kernel masks
    kp = kp.astype(jnp.bfloat16)

    # ---- Generation-aware VMEM budget (v7x has 64 MiB/TC vs 128 on v5e/v6e).
    try:
        vmem_cap = int(pltpu.get_tpu_info().vmem_capacity_bytes)
    except Exception:
        vmem_cap = 64 * 2**20                       # conservative: v7x per-TC
    budget = int(vmem_cap * 0.6)
    # Bytes that do not scale with TQ: double-buffered kp block + tiny weights.
    fixed_bytes = 2 * HID * HWp * 2 + 2 * (D * HID * 2 + HID * 4)
    # Bytes per query row: double-buffered f32 out block + q block + in-kernel
    # temporaries (qp/qpT f32, one logits row + one exp row per head in flight).
    per_row = 2 * num_heads * HWp * 4 + 2 * D * 2 + 2 * HID * 4 + 2 * HWp * 4
    tq_cap = max(8, ((budget - fixed_bytes) // per_row) // 8 * 8)

    # ---- Q tiling: softmax is per query row, so tiling Q is exact.  Pick the
    # multiple-of-8 tile that minimizes padding; if B == 1 force >= 2 grid
    # steps so both TensorCores of a 2-TC chip (v7x) are used.
    max_tq = min(128, _round_up(Q, 8), tq_cap)
    if B == 1 and Q >= 16:
        max_tq = min(max_tq, _round_up(_ceil_div(Q, 2), 8))
    best_tq, best_qp = 8, _round_up(Q, 8) * (Q + 8)
    for t in range(8, max_tq + 1, 8):
        qp_pad = _round_up(Q, t)
        if qp_pad < best_qp or (qp_pad == best_qp and t > best_tq):
            best_tq, best_qp = t, qp_pad
    TQ, Qp = best_tq, best_qp
    nq = Qp // TQ

    q_in = q.astype(jnp.bfloat16)
    if Qp != Q:
        q_in = jnp.pad(q_in, ((0, 0), (0, Qp - Q), (0, 0)))

    need = fixed_bytes + TQ * per_row
    vmem_limit = int(min(max(need + (4 << 20), 16 << 20),
                         int(vmem_cap * 0.9)))

    kernel = functools.partial(_mha_map_kernel, num_heads=num_heads,
                               head_dim=head_dim, hw_valid=HW)

    # Note: the grid-invariant inputs (kp, wq, bq) could be single-buffered
    # (pl.Buffered(1)) to shave a little VMEM on v7x; they are small and the
    # double-buffer is already counted in the budget above.
    out_flat = pl.pallas_call(
        kernel,
        out_shape=jax.ShapeDtypeStruct((B, Qp, num_heads * HWp), jnp.float32),
        grid=(B, nq),
        in_specs=[
            pl.BlockSpec((1, TQ, D), lambda b, iq: (b, iq, 0)),      # q
            pl.BlockSpec((1, HID, HWp), lambda b, iq: (b, 0, 0)),    # kp (hoisted)
            pl.BlockSpec((D, HID), lambda b, iq: (0, 0)),            # wq * norm
            pl.BlockSpec((1, HID), lambda b, iq: (0, 0)),            # bq * norm
        ],
        out_specs=pl.BlockSpec((1, TQ, num_heads * HWp),
                               lambda b, iq: (b, iq, 0)),
        compiler_params=pltpu.CompilerParams(
            dimension_semantics=("parallel", "parallel"),
            vmem_limit_bytes=vmem_limit),
    )(q_in, kp, wq_s, bq_s)

    # (B, Qp, N*HWp) -> (B, Q, N, H, W); the slice only exists when padding
    # exists (with Q % 8 == 0 and H*W % 128 == 0 this is a free reshape).
    out = out_flat.reshape(B, Qp, num_heads, HWp)
    if Qp != Q or HWp != HW:
        out = out[:, :Q, :, :HW]
    return out.reshape(B, Q, num_heads, H, W)


def _reference(q, k, wq, bq, wk, bk, num_heads):
    """Pure-JAX f32 reference mirroring the PyTorch forward."""
    B, Q, D = q.shape
    _, _, H, W = k.shape
    HID = wq.shape[1]
    c = HID // num_heads
    norm = float(HID / num_heads) ** (-0.5)
    qp = q @ wq + bq                                            # (B, Q, HID)
    kp = jnp.einsum('bdhw,de->behw', k, wk) + bk[None, :, None, None]
    qh = qp.reshape(B, Q, num_heads, c)
    kh = kp.reshape(B, num_heads, c, H, W)
    weights = jnp.einsum('bqnc,bnchw->bqnhw', qh * norm, kh)
    flat = weights.reshape(B, Q, -1)
    flat = jax.nn.softmax(flat, axis=-1)
    return flat.reshape(B, Q, num_heads, H, W)
    # TODO(synk): optional `mask` arg (masked_fill with -inf) not implemented;
    # the module is exercised with mask=None. Dropout(p=0.0) is identity.


if __name__ == "__main__":
    # Module hyperparameters.
    query_dim = 4
    hidden_dim = 32
    num_heads = 4

    # Input shapes.
    B, Q = 2, 8
    H, W = 16, 16

    key = jax.random.PRNGKey(0)
    k_wq, k_wk, k_q, k_k = jax.random.split(key, 4)

    # Xavier-uniform init for the linear weights, zero biases (as in __init__).
    bound = (6.0 / (query_dim + hidden_dim)) ** 0.5
    # Stored transposed: (query_dim, hidden_dim) so the projection is x @ W.
    wq = jax.random.uniform(k_wq, (query_dim, hidden_dim), jnp.float32,
                            minval=-bound, maxval=bound)
    wk = jax.random.uniform(k_wk, (query_dim, hidden_dim), jnp.float32,
                            minval=-bound, maxval=bound)
    bq = jnp.zeros((hidden_dim,), jnp.float32)
    bk = jnp.zeros((hidden_dim,), jnp.float32)

    q = jax.random.normal(k_q, (B, Q, query_dim), jnp.float32)
    k = jax.random.normal(k_k, (B, query_dim, H, W), jnp.float32)

    out = mh_attention_map(q, k, wq, bq, wk, bk, num_heads)
    out = jax.block_until_ready(out)

    ref = _reference(q, k, wq, bq, wk, bk, num_heads)
    assert out.shape == (B, Q, num_heads, H, W)
    # bf16 MXU operands => relaxed tolerance vs the f32 reference.
    assert jnp.allclose(out, ref, atol=1e-4, rtol=2e-2)
    # Exact reciprocal in the kernel => softmax rows sum to ~1.
    assert jnp.allclose(out.reshape(B, Q, -1).sum(-1), 1.0, atol=2e-3)

    print("KERNEL_OK")
</pallas_src>

<mosaic_0001>
module attributes {stable_mosaic.version = 11 : i64} {
  func.func @_mha_map_kernel(%arg0: i32, %arg1: i32, %arg2: memref<1x8x4xbf16, #tpu.memory_space<vmem>>, %arg3: memref<1x32x256xbf16, #tpu.memory_space<vmem>>, %arg4: memref<4x32xbf16, #tpu.memory_space<vmem>>, %arg5: memref<1x32xf32, #tpu.memory_space<vmem>>, %arg6: memref<1x8x1024xf32, #tpu.memory_space<vmem>>) attributes {dimension_semantics = [#tpu.dimension_semantics<parallel>, #tpu.dimension_semantics<parallel>], iteration_bounds = array<i64: 2, 1>, scalar_prefetch = 0 : i64, scratch_operands = 0 : i64, tpu.core_type = #tpu.core_type<tc>, window_params = [{transform_indices = @transform_0, window_bounds = array<i64: 1, 8, 4>}, {transform_indices = @transform_1, window_bounds = array<i64: 1, 32, 256>}, {pipeline_mode = #tpu.pipeline_mode<synchronous>, transform_indices = @transform_2, window_bounds = array<i64: 4, 32>}, {pipeline_mode = #tpu.pipeline_mode<synchronous>, transform_indices = @transform_3, window_bounds = array<i64: 1, 32>}, {transform_indices = @transform_4, window_bounds = array<i64: 1, 8, 1024>}]} {
    %c0 = arith.constant 0 : index
    %c0_0 = arith.constant 0 : index
    %c0_1 = arith.constant 0 : index
    %0 = vector.load %arg2[%c0, %c0_0, %c0_1] : memref<1x8x4xbf16, #tpu.memory_space<vmem>>, vector<1x8x4xbf16>
    %1 = vector.shape_cast %0 : vector<1x8x4xbf16> to vector<8x4xbf16>
    %c0_2 = arith.constant 0 : index
    %c0_3 = arith.constant 0 : index
    %2 = vector.load %arg4[%c0_2, %c0_3] : memref<4x32xbf16, #tpu.memory_space<vmem>>, vector<4x32xbf16>
    %cst = arith.constant dense<0.000000e+00> : vector<8x32xf32>
    %3 = tpu.matmul %1, %2, %cst {dimension_numbers = #tpu.dot_dimension_numbers<[1], [0], [0], [1], [0, 0, 1, 1], [], []>} : vector<8x4xbf16>, vector<4x32xbf16>, vector<8x32xf32> -> vector<8x32xf32>
    %c0_4 = arith.constant 0 : index
    %c0_5 = arith.constant 0 : index
    %4 = vector.load %arg5[%c0_4, %c0_5] : memref<1x32xf32, #tpu.memory_space<vmem>>, vector<1x32xf32>
    %5 = vector.broadcast %4 : vector<1x32xf32> to vector<8x32xf32>
    %6 = arith.addf %3, %5 : vector<8x32xf32>
    %7 = tpu.transpose %6, [1, 0] : vector<8x32xf32> -> vector<32x8xf32>
    %cst_6 = arith.constant 0xFF800000 : f32
    %8 = vector.broadcast %cst_6 : f32 to vector<8x1xf32>
    %cst_7 = arith.constant 0.000000e+00 : f32
    %9 = vector.broadcast %cst_7 : f32 to vector<8x1xf32>
    %10 = vector.extract_strided_slice %7 {offsets = [0, 0], sizes = [8, 8], strides = [1, 1]} : vector<32x8xf32> to vector<8x8xf32>
    %11 = arith.truncf %10 : vector<8x8xf32> to vector<8x8xbf16>
    %c0_8 = arith.constant 0 : index
    %c0_9 = arith.constant 0 : index
    %c0_10 = arith.constant 0 : index
    %12 = vector.load %arg3[%c0_8, %c0_9, %c0_10] : memref<1x32x256xbf16, #tpu.memory_space<vmem>>, vector<1x8x256xbf16>
    %13 = vector.shape_cast %12 : vector<1x8x256xbf16> to vector<8x256xbf16>
    %cst_11 = arith.constant dense<0.000000e+00> : vector<8x256xf32>
    %14 = tpu.matmul %11, %13, %cst_11 {dimension_numbers = #tpu.dot_dimension_numbers<[0], [0], [1], [1], [0, 1, 1, 1], [], []>} : vector<8x8xbf16>, vector<8x256xbf16>, vector<8x256xf32> -> vector<8x256xf32>
    %c0_12 = arith.constant 0 : index
    %c0_13 = arith.constant 0 : index
    %c0_14 = arith.constant 0 : index
    %15 = vector.load %arg6[%c0_12, %c0_13, %c0_14] : memref<1x8x1024xf32, #tpu.memory_space<vmem>>, vector<1x8x256xf32>
    %16 = vector.shape_cast %15 : vector<1x8x256xf32> to vector<8x256xf32>
    %17 = vector.shape_cast %14 : vector<8x256xf32> to vector<1x8x256xf32>
    tpu.vector_store %arg6[%c0_12, %c0_13, %c0_14], %17 {strides = array<i32>} : memref<1x8x1024xf32, #tpu.memory_space<vmem>>, vector<1x8x256xf32>,
    %cst_15 = arith.constant dense<0xFF800000> : vector<8xf32>
    %18 = vector.multi_reduction <maximumf>, %14, %cst_15 [1] : vector<8x256xf32> to vector<8xf32>
    %19 = vector.shape_cast %18 : vector<8xf32> to vector<8x1xf32>
    %20 = arith.maximumf %8, %19 : vector<8x1xf32>
    %21 = vector.broadcast %20 : vector<8x1xf32> to vector<8x256xf32>
    %22 = arith.subf %14, %21 : vector<8x256xf32>
    %23 = math.exp %22 : vector<8x256xf32>
    %cst_16 = arith.constant dense<0.000000e+00> : vector<8xf32>
    %24 = vector.multi_reduction <add>, %23, %cst_16 [1] : vector<8x256xf32> to vector<8xf32>
    %25 = vector.shape_cast %24 : vector<8xf32> to vector<8x1xf32>
    %26 = arith.subf %8, %20 : vector<8x1xf32>
    %27 = math.exp %26 : vector<8x1xf32>
    %28 = arith.mulf %9, %27 : vector<8x1xf32>
    %29 = arith.addf %28, %25 : vector<8x1xf32>
    %30 = vector.extract_strided_slice %7 {offsets = [8, 0], sizes = [8, 8], strides = [1, 1]} : vector<32x8xf32> to vector<8x8xf32>
    %31 = arith.truncf %30 : vector<8x8xf32> to vector<8x8xbf16>
    %c0_17 = arith.constant 0 : index
    %c8 = arith.constant 8 : index
    %c0_18 = arith.constant 0 : index
    %32 = vector.load %arg3[%c0_17, %c8, %c0_18] : memref<1x32x256xbf16, #tpu.memory_space<vmem>>, vector<1x8x256xbf16>
    %33 = vector.shape_cast %32 : vector<1x8x256xbf16> to vector<8x256xbf16>
    %cst_19 = arith.constant dense<0.000000e+00> : vector<8x256xf32>
    %34 = tpu.matmul %31, %33, %cst_19 {dimension_numbers = #tpu.dot_dimension_numbers<[0], [0], [1], [1], [0, 1, 1, 1], [], []>} : vector<8x8xbf16>, vector<8x256xbf16>, vector<8x256xf32> -> vector<8x256xf32>
    %c0_20 = arith.constant 0 : index
    %c0_21 = arith.constant 0 : index
    %c256 = arith.constant 256 : index
    %35 = vector.load %arg6[%c0_20, %c0_21, %c256] : memref<1x8x1024xf32, #tpu.memory_space<vmem>>, vector<1x8x256xf32>
    %36 = vector.shape_cast %35 : vector<1x8x256xf32> to vector<8x256xf32>
    %37 = vector.shape_cast %34 : vector<8x256xf32> to vector<1x8x256xf32>
    tpu.vector_store %arg6[%c0_20, %c0_21, %c256], %37 {strides = array<i32>} : memref<1x8x1024xf32, #tpu.memory_space<vmem>>, vector<1x8x256xf32>,
    %cst_22 = arith.constant dense<0xFF800000> : vector<8xf32>
    %38 = vector.multi_reduction <maximumf>, %34, %cst_22 [1] : vector<8x256xf32> to vector<8xf32>
    %39 = vector.shape_cast %38 : vector<8xf32> to vector<8x1xf32>
    %40 = arith.maximumf %20, %39 : vector<8x1xf32>
    %41 = vector.broadcast %40 : vector<8x1xf32> to vector<8x256xf32>
    %42 = arith.subf %34, %41 : vector<8x256xf32>
    %43 = math.exp %42 : vector<8x256xf32>
    %cst_23 = arith.constant dense<0.000000e+00> : vector<8xf32>
    %44 = vector.multi_reduction <add>, %43, %cst_23 [1] : vector<8x256xf32> to vector<8xf32>
    %45 = vector.shape_cast %44 : vector<8xf32> to vector<8x1xf32>
    %46 = arith.subf %20, %40 : vector<8x1xf32>
    %47 = math.exp %46 : vector<8x1xf32>
    %48 = arith.mulf %29, %47 : vector<8x1xf32>
    %49 = arith.addf %48, %45 : vector<8x1xf32>
    %50 = vector.extract_strided_slice %7 {offsets = [16, 0], sizes = [8, 8], strides = [1, 1]} : vector<32x8xf32> to vector<8x8xf32>
    %51 = arith.truncf %50 : vector<8x8xf32> to vector<8x8xbf16>
    %c0_24 = arith.constant 0 : index
    %c16 = arith.constant 16 : index
    %c0_25 = arith.constant 0 : index
    %52 = vector.load %arg3[%c0_24, %c16, %c0_25] : memref<1x32x256xbf16, #tpu.memory_space<vmem>>, vector<1x8x256xbf16>
    %53 = vector.shape_cast %52 : vector<1x8x256xbf16> to vector<8x256xbf16>
    %cst_26 = arith.constant dense<0.000000e+00> : vector<8x256xf32>
    %54 = tpu.matmul %51, %53, %cst_26 {dimension_numbers = #tpu.dot_dimension_numbers<[0], [0], [1], [1], [0, 1, 1, 1], [], []>} : vector<8x8xbf16>, vector<8x256xbf16>, vector<8x256xf32> -> vector<8x256xf32>
    %c0_27 = arith.constant 0 : index
    %c0_28 = arith.constant 0 : index
    %c512 = arith.constant 512 : index
    %55 = vector.load %arg6[%c0_27, %c0_28, %c512] : memref<1x8x1024xf32, #tpu.memory_space<vmem>>, vector<1x8x256xf32>
    %56 = vector.shape_cast %55 : vector<1x8x256xf32> to vector<8x256xf32>
    %57 = vector.shape_cast %54 : vector<8x256xf32> to vector<1x8x256xf32>
    tpu.vector_store %arg6[%c0_27, %c0_28, %c512], %57 {strides = array<i32>} : memref<1x8x1024xf32, #tpu.memory_space<vmem>>, vector<1x8x256xf32>,
    %cst_29 = arith.constant dense<0xFF800000> : vector<8xf32>
    %58 = vector.multi_reduction <maximumf>, %54, %cst_29 [1] : vector<8x256xf32> to vector<8xf32>
    %59 = vector.shape_cast %58 : vector<8xf32> to vector<8x1xf32>
    %60 = arith.maximumf %40, %59 : vector<8x1xf32>
    %61 = vector.broadcast %60 : vector<8x1xf32> to vector<8x256xf32>
    %62 = arith.subf %54, %61 : vector<8x256xf32>
    %63 = math.exp %62 : vector<8x256xf32>
    %cst_30 = arith.constant dense<0.000000e+00> : vector<8xf32>
    %64 = vector.multi_reduction <add>, %63, %cst_30 [1] : vector<8x256xf32> to vector<8xf32>
    %65 = vector.shape_cast %64 : vector<8xf32> to vector<8x1xf32>
    %66 = arith.subf %40, %60 : vector<8x1xf32>
    %67 = math.exp %66 : vector<8x1xf32>
    %68 = arith.mulf %49, %67 : vector<8x1xf32>
    %69 = arith.addf %68, %65 : vector<8x1xf32>
    %70 = vector.extract_strided_slice %7 {offsets = [24, 0], sizes = [8, 8], strides = [1, 1]} : vector<32x8xf32> to vector<8x8xf32>
    %71 = arith.truncf %70 : vector<8x8xf32> to vector<8x8xbf16>
    %c0_31 = arith.constant 0 : index
    %c24 = arith.constant 24 : index
    %c0_32 = arith.constant 0 : index
    %72 = vector.load %arg3[%c0_31, %c24, %c0_32] : memref<1x32x256xbf16, #tpu.memory_space<vmem>>, vector<1x8x256xbf16>
    %73 = vector.shape_cast %72 : vector<1x8x256xbf16> to vector<8x256xbf16>
    %cst_33 = arith.constant dense<0.000000e+00> : vector<8x256xf32>
    %74 = tpu.matmul %71, %73, %cst_33 {dimension_numbers = #tpu.dot_dimension_numbers<[0], [0], [1], [1], [0, 1, 1, 1], [], []>} : vector<8x8xbf16>, vector<8x256xbf16>, vector<8x256xf32> -> vector<8x256xf32>
    %c0_34 = arith.constant 0 : index
    %c0_35 = arith.constant 0 : index
    %c768 = arith.constant 768 : index
    %75 = vector.load %arg6[%c0_34, %c0_35, %c768] : memref<1x8x1024xf32, #tpu.memory_space<vmem>>, vector<1x8x256xf32>
    %76 = vector.shape_cast %75 : vector<1x8x256xf32> to vector<8x256xf32>
    %77 = vector.shape_cast %74 : vector<8x256xf32> to vector<1x8x256xf32>
    tpu.vector_store %arg6[%c0_34, %c0_35, %c768], %77 {strides = array<i32>} : memref<1x8x1024xf32, #tpu.memory_space<vmem>>, vector<1x8x256xf32>,
    %cst_36 = arith.constant dense<0xFF800000> : vector<8xf32>
    %78 = vector.multi_reduction <maximumf>, %74, %cst_36 [1] : vector<8x256xf32> to vector<8xf32>
    %79 = vector.shape_cast %78 : vector<8xf32> to vector<8x1xf32>
    %80 = arith.maximumf %60, %79 : vector<8x1xf32>
    %81 = vector.broadcast %80 : vector<8x1xf32> to vector<8x256xf32>
    %82 = arith.subf %74, %81 : vector<8x256xf32>
    %83 = math.exp %82 : vector<8x256xf32>
    %cst_37 = arith.constant dense<0.000000e+00> : vector<8xf32>
    %84 = vector.multi_reduction <add>, %83, %cst_37 [1] : vector<8x256xf32> to vector<8xf32>
    %85 = vector.shape_cast %84 : vector<8xf32> to vector<8x1xf32>
    %86 = arith.subf %60, %80 : vector<8x1xf32>
    %87 = math.exp %86 : vector<8x1xf32>
    %88 = arith.mulf %69, %87 : vector<8x1xf32>
    %89 = arith.addf %88, %85 : vector<8x1xf32>
    %90 = tpu.reciprocal %89 : vector<8x1xf32> -> vector<8x1xf32>
    %c0_38 = arith.constant 0 : index
    %c0_39 = arith.constant 0 : index
    %c0_40 = arith.constant 0 : index
    %91 = vector.load %arg6[%c0_38, %c0_39, %c0_40] : memref<1x8x1024xf32, #tpu.memory_space<vmem>>, vector<1x8x256xf32>
    %92 = vector.shape_cast %91 : vector<1x8x256xf32> to vector<8x256xf32>
    %93 = vector.broadcast %80 : vector<8x1xf32> to vector<8x256xf32>
    %94 = arith.subf %92, %93 : vector<8x256xf32>
    %95 = math.exp %94 : vector<8x256xf32>
    %96 = vector.broadcast %90 : vector<8x1xf32> to vector<8x256xf32>
    %97 = arith.mulf %95, %96 : vector<8x256xf32>
    %c0_41 = arith.constant 0 : index
    %c0_42 = arith.constant 0 : index
    %c0_43 = arith.constant 0 : index
    %98 = vector.load %arg6[%c0_41, %c0_42, %c0_43] : memref<1x8x1024xf32, #tpu.memory_space<vmem>>, vector<1x8x256xf32>
    %99 = vector.shape_cast %98 : vector<1x8x256xf32> to vector<8x256xf32>
    %100 = vector.shape_cast %97 : vector<8x256xf32> to vector<1x8x256xf32>
    tpu.vector_store %arg6[%c0_41, %c0_42, %c0_43], %100 {strides = array<i32>} : memref<1x8x1024xf32, #tpu.memory_space<vmem>>, vector<1x8x256xf32>,
    %c0_44 = arith.constant 0 : index
    %c0_45 = arith.constant 0 : index
    %c256_46 = arith.constant 256 : index
    %101 = vector.load %arg6[%c0_44, %c0_45, %c256_46] : memref<1x8x1024xf32, #tpu.memory_space<vmem>>, vector<1x8x256xf32>
    %102 = vector.shape_cast %101 : vector<1x8x256xf32> to vector<8x256xf32>
    %103 = vector.broadcast %80 : vector<8x1xf32> to vector<8x256xf32>
    %104 = arith.subf %102, %103 : vector<8x256xf32>
    %105 = math.exp %104 : vector<8x256xf32>
    %106 = vector.broadcast %90 : vector<8x1xf32> to vector<8x256xf32>
    %107 = arith.mulf %105, %106 : vector<8x256xf32>
    %c0_47 = arith.constant 0 : index
    %c0_48 = arith.constant 0 : index
    %c256_49 = arith.constant 256 : index
    %108 = vector.load %arg6[%c0_47, %c0_48, %c256_49] : memref<1x8x1024xf32, #tpu.memory_space<vmem>>, vector<1x8x256xf32>
    %109 = vector.shape_cast %108 : vector<1x8x256xf32> to vector<8x256xf32>
    %110 = vector.shape_cast %107 : vector<8x256xf32> to vector<1x8x256xf32>
    tpu.vector_store %arg6[%c0_47, %c0_48, %c256_49], %110 {strides = array<i32>} : memref<1x8x1024xf32, #tpu.memory_space<vmem>>, vector<1x8x256xf32>,
    %c0_50 = arith.constant 0 : index
    %c0_51 = arith.constant 0 : index
    %c512_52 = arith.constant 512 : index
    %111 = vector.load %arg6[%c0_50, %c0_51, %c512_52] : memref<1x8x1024xf32, #tpu.memory_space<vmem>>, vector<1x8x256xf32>
    %112 = vector.shape_cast %111 : vector<1x8x256xf32> to vector<8x256xf32>
    %113 = vector.broadcast %80 : vector<8x1xf32> to vector<8x256xf32>
    %114 = arith.subf %112, %113 : vector<8x256xf32>
    %115 = math.exp %114 : vector<8x256xf32>
    %116 = vector.broadcast %90 : vector<8x1xf32> to vector<8x256xf32>
    %117 = arith.mulf %115, %116 : vector<8x256xf32>
    %c0_53 = arith.constant 0 : index
    %c0_54 = arith.constant 0 : index
    %c512_55 = arith.constant 512 : index
    %118 = vector.load %arg6[%c0_53, %c0_54, %c512_55] : memref<1x8x1024xf32, #tpu.memory_space<vmem>>, vector<1x8x256xf32>
    %119 = vector.shape_cast %118 : vector<1x8x256xf32> to vector<8x256xf32>
    %120 = vector.shape_cast %117 : vector<8x256xf32> to vector<1x8x256xf32>
    tpu.vector_store %arg6[%c0_53, %c0_54, %c512_55], %120 {strides = array<i32>} : memref<1x8x1024xf32, #tpu.memory_space<vmem>>, vector<1x8x256xf32>,
    %c0_56 = arith.constant 0 : index
    %c0_57 = arith.constant 0 : index
    %c768_58 = arith.constant 768 : index
    %121 = vector.load %arg6[%c0_56, %c0_57, %c768_58] : memref<1x8x1024xf32, #tpu.memory_space<vmem>>, vector<1x8x256xf32>
    %122 = vector.shape_cast %121 : vector<1x8x256xf32> to vector<8x256xf32>
    %123 = vector.broadcast %80 : vector<8x1xf32> to vector<8x256xf32>
    %124 = arith.subf %122, %123 : vector<8x256xf32>
    %125 = math.exp %124 : vector<8x256xf32>
    %126 = vector.broadcast %90 : vector<8x1xf32> to vector<8x256xf32>
    %127 = arith.mulf %125, %126 : vector<8x256xf32>
    %c0_59 = arith.constant 0 : index
    %c0_60 = arith.constant 0 : index
    %c768_61 = arith.constant 768 : index
    %128 = vector.load %arg6[%c0_59, %c0_60, %c768_61] : memref<1x8x1024xf32, #tpu.memory_space<vmem>>, vector<1x8x256xf32>
    %129 = vector.shape_cast %128 : vector<1x8x256xf32> to vector<8x256xf32>
    %130 = vector.shape_cast %127 : vector<8x256xf32> to vector<1x8x256xf32>
    tpu.vector_store %arg6[%c0_59, %c0_60, %c768_61], %130 {strides = array<i32>} : memref<1x8x1024xf32, #tpu.memory_space<vmem>>, vector<1x8x256xf32>,
    return
  }
  func.func @transform_0(%arg0: i32, %arg1: i32) -> (i32, i32, i32) {
    %c0_i32 = arith.constant 0 : i32
    %c0_i32_0 = arith.constant 0 : i32
    return %arg0, %arg1, %c0_i32 : i32, i32, i32
  }
  func.func @transform_1(%arg0: i32, %arg1: i32) -> (i32, i32, i32) {
    %c0_i32 = arith.constant 0 : i32
    %c0_i32_0 = arith.constant 0 : i32
    %c0_i32_1 = arith.constant 0 : i32
    return %arg0, %c0_i32, %c0_i32_0 : i32, i32, i32
  }
  func.func @transform_2(%arg0: i32, %arg1: i32) -> (i32, i32) {
    %c0_i32 = arith.constant 0 : i32
    %c0_i32_0 = arith.constant 0 : i32
    %c0_i32_1 = arith.constant 0 : i32
    return %c0_i32, %c0_i32_0 : i32, i32
  }
  func.func @transform_3(%arg0: i32, %arg1: i32) -> (i32, i32) {
    %c0_i32 = arith.constant 0 : i32
    %c0_i32_0 = arith.constant 0 : i32
    %c0_i32_1 = arith.constant 0 : i32
    return %c0_i32, %c0_i32_0 : i32, i32
  }
  func.func @transform_4(%arg0: i32, %arg1: i32) -> (i32, i32, i32) {
    %c0_i32 = arith.constant 0 : i32
    %c0_i32_0 = arith.constant 0 : i32
    return %arg0, %arg1, %c0_i32 : i32, i32, i32
  }
}

</mosaic_0001>

<bundles_post_ra>
// kernel: tpu_custom_call.1
= control target key start
LH: loop header
LB: loop body
LE: loop exit
PB: predicated region body
PF: predicated region fallthrough
CT: control target
= control target key end

     0   :  { %9 = vsyncpa [#allocation3], 0  ;;  %s1426_s0 = inlined_call_operand.vmem [shape: bf16[2,8,4], index: 0, kind: input, shape index: {}]   ;;  %s1427_s1 = inlined_call_operand.hbm [shape: bf16[2,32,256], index: 1, kind: input, shape index: {}]   ;;  %s1428_s2 = inlined_call_operand.vmem [shape: bf16[4,32], index: 2, kind: input, shape index: {}]   ;;  %s1429_s3 = inlined_call_operand.vmem [shape: f32[1,32], index: 3, kind: input, shape index: {}]   ;;  %s1430_s4 = inlined_call_operand.hbm [shape: f32[2,8,1024], index: 4, kind: output, shape index: {}]  }
   0x1   :  { %11 = vsyncpa [#allocation3 + $0x1], 0 }
   0x2   :  { %12 = vsyncpa [#allocation4], 0 }
   0x3   :  { %14 = vsyncpa [#allocation4 + $0x1], 0  ;;  %s1186_s15 = smov 0   ;;  %s1188_s16 = smov 0  }
   0x4   :  { %s1190_s17 = smov 0   ;;  %s1192_s18 = smov 0  }
   0x5   :  { %s1194_s19 = smov 0   ;;  %s1196_s20 = smov 0  }
   0x6 LB: > { %s883_s21 = sadd.s32 4294967295, %s1152_s20   ;;  %s884_s22 = sadd.s32 4294967294, %s1152_s20   ;;  %s1152_s20 = sphi %s1196_s20, %s20_s20   ;;  %s1148_s19 = sphi %s1194_s19, %s1445_s19   ;;  %s1144_s18 = sphi %s1192_s18, %s1444_s18   ;;  %s1140_s17 = sphi %s1190_s17, %s1443_s17   ;;  %s1136_s16 = sphi %s1188_s16, %s1442_s16   ;;  %s1132_s15 = sphi %s1186_s15, %s1441_s15  }
   0x7   : > { %s32_s23 = sadd.s32 1, %s1148_s19  ;;  %s67_s24 = sadd.s32 1, %s1140_s17 }
   0x8   : > { %p34_p0 = scmp.ge.s32.totalorder %s32_s23, 2  ;;  %p74_p1 = scmp.ne.s32.totalorder %s1140_s17, %s1136_s16 }
   0x9   : > { %p75_p2 = scmp.eq.s32.totalorder %s1152_s20, 0  ;;  %p80_p3 = scmp.ne.s32.totalorder %s1136_s16, %s1132_s15 }
   0xa   : > { %s1447_s23 = smov (%p34_p0, %s32_s23), 0  ;;  %p81_p5 = scmp.eq.s32.totalorder %s883_s21, 0 }
   0xb   : > { %p1227_p4 = por %p75_p2, %p74_p1  ;;  %s64_s26 = ssub.s32 %s1148_s19, %s1447_s23 }
   0xc   : > { %p148_p6 = scmp.eq.s32.totalorder %s883_s21, 1  ;;  %p65_p7 = scmp.eq.s32.totalorder %s64_s26, 0 }
   0xd   : > { %p1233_p8 = por %p81_p5, %p80_p3  ;;  %p154_p10 = scmp.eq.s32.totalorder %s884_s22, 1 }
   0xe   : > { %p1237_p9 = por %p148_p6, %p74_p1  ;;  %p939_p13 = scmp.lt.s32.totalorder %s1152_s20, 2 }
   0xf   : > { %s1242_s29 = scalar_select %p65_p7, %s1140_s17, %s67_s24  }
  0x10   : > { %s1434_s28 = scalar_select %p1237_p9, 1, 0 }
  0x11   : > { %p1244_p11 = por %p154_p10, %p80_p3  ;;  %s190_s5 = sand.u32 1, %s1140_s17  }
  0x12   : > { %s887_s6 = sshll.u32 %s190_s5, 5  ;;  %s917_s7 = sshll.u32 %s1148_s19, 9 }
  0x13   : > { %s1435_s30 = scalar_select %p1244_p11, 1, 0 }
  0x14   : > { %s1255_s10 = scalar_lea.hbm %s1427_s1, %s917_s7  ;;  %s194_s11 = scalar_lea.vmem [#allocation2], %s887_s6 }
  0x15   : > { %s201_s12 = sshll.u32 %s194_s11, 4  ;;  %p1261_p0 = pnand %p939_p13, %p1227_p4  ;;  %s1257_s12 = int_to_ptr.vmem [resolvable:$true] %s201_s12 }
  0x16   : > { %s1266_s14 = scalar_lea.sflag [#allocation3], %s190_s5  ;;  %s1040_s21 = scalar_lea.hbm %s1255_s10, 512 }
  0x17   : > { %p1041_p2 = scmp.ne.s32.totalorder %s1255_s10, %s1040_s21  ;;  %p1042_p3 = pneg %p1261_p0 }
  0x18   : > { %s1045_s25 = scalar_lea.hbm %s1427_s1, 1024  ;;  %p1046_p4 = scmp.lt.u32.totalorder %s1255_s10, %s1427_s1 }
  0x19   : > { %p1043_p5 = pnand %p1042_p3, %p1041_p2  ;;  %p1047_p7 = scmp.lt.u32.totalorder %s1045_s25, %s1040_s21 }
  0x1a   : > { %p1049_p13 = scmp.lt.u32.totalorder %s1040_s21, %s1255_s10 }
  0x1b   : > { %p1044_p6 = pneg %p1043_p5  ;;  %p1048_p10 = por %p1047_p7, %p1046_p4 }
  0x1d   : > { %p1050_p12 = por %p1049_p13, %p1048_p10 }
  0x1f   : > { %p1051_p1 = pnand %p1050_p12, %p1044_p6 }
  0x21   : > { %1054 = shalt.err (!%p1051_p1)
}
  0x22   : > { %s1055_s5 = scalar_lea.vmem %s1257_s12, 512  ;;  %s1154_s7 = smov [#allocation2]  }
  0x23   : > { %p1056_p2 = scmp.ne.s32.totalorder %s1257_s12, %s1055_s5  ;;  %s1060_s8 = sshll.u32 %s1154_s7, 4  ;;  %s1061_s8 = int_to_ptr.vmem [resolvable:$false] %s1060_s8 }
  0x24   : > { %s1062_s9 = scalar_lea.vmem %s1061_s8, 1024  ;;  %p1063_p9 = scmp.lt.s32.totalorder %s1257_s12, %s1061_s8 }
  0x25   : > { %p1058_p5 = pnand %p1056_p2, %p1042_p3  ;;  %p1064_p4 = scmp.lt.s32.totalorder %s1062_s9, %s1055_s5 }
  0x27   : > { %p1059_p11 = pneg %p1058_p5  ;;  %p1065_p7 = por %p1064_p4, %p1063_p9 }
  0x29   : > { %p1066_p10 = pnand %p1065_p7, %p1059_p11 }
  0x2b   : > { %1069 = shalt.err (!%p1066_p10)
}
  0x2c   : > { %s1155_s11 = smov 128   ;;  %s1156_s21 = smov 8  }
  0x2d   : > { %934 = dma.hbm_to_vmem [thread:$0]  (!%p1261_p0), %s1255_s10, 512, %s1257_s12, %s1266_s14, %s1155_s11, %s1155_s11, %s1156_s21  }
  0x2e   : > { %p209_p12 = scmp.lt.s32.totalorder %s1152_s20, 3  ;;  %p1437_p1 = scmp.ge.s32.totalorder %s1152_s20, 1 }
  0x30   : > { %p210_p3 = pnand %p1437_p1, %p209_p12 }
  0x31   : > { %s1298_s22 = sand.u32 (!%p210_p3), 1, %s1136_s16  }
  0x32   : > { %213 = sbr.rel (%p210_p3) target bundleno = 1076 (0x434), region = 36  ;;  %s891_s24 = sshll.u32 (!%p210_p3), %s1298_s22, 5 }
  0x33   : > { %s216_s25 = scalar_lea.sflag (!%p210_p3), [#allocation3], %s1298_s22  ;;  %s1302_s26 = scalar_lea.vmem (!%p210_p3), [#allocation2], %s891_s24 }
  0x39   : > { %1123 = dma.done.wait (%p1233_p8), %s216_s25, 512  }
  0x3a   : > { %1125 = vsyncadd (%p1233_p8), %s216_s25, 4294966784  ;;  %p251_p9 = scmp.lt.s32.totalorder %s1144_s18, 1  ;;  %v1157_v0 = vmov 0.0   ;;  %vm1158_vm0 = vmmov 0   ;;  %vm272_vm1 = vcmask 1041408   ;;  %vm268_vm2 = vcmask 31744  }
  0x3b   : > { %921 = vmatprep.subr.bf16.mxu0 %v1157_v0  ;;  %923 = vmatprep.mubr.msk.bf16.mxu0 %vm1158_vm0, %v1157_v0  ;;  %v260_v1 = vld [vmem:[%s1428_s2] sm:$0x3]  ;;  %v349_v10 = vld [vmem:[%s1302_s26] sm:$0xff]  ;;  %vm375_vm3 = vcmask 1043456   ;;  %v443_v11 = vld [vmem:[%s1302_s26 + $0x8] sm:$0xff]  ;;  %v1159_v17 = vmov 0  }
  0x3c   : > { %s252_s10 = scalar_select %p251_p9, %s1144_s18, 1  ;;  %v274_v2 = vsel %vm272_vm1, %v260_v1, 0  ;;  %v894_v4 = vld [vmem:[%s1429_s3] ss:$0 sm:$0xff]  ;;  %v536_v12 = vld [vmem:[%s1302_s26 + $0x10] sm:$0xff]  ;;  %v897_v13 = vcombine.high %v349_v10, %v349_v10  ;;  %v901_v14 = vcombine.high %v443_v11, %v443_v11  ;;  %v896_v15 = vcombine.low %v349_v10, %v349_v10  ;;  %414 = vmatprep.mubr.bf16.mxu1 %v1159_v17 }
  0x3d   : > { %922 = vmatpush3.bf16.msra.mxu0 %v274_v2  ;;  %v900_v16 = vcombine.low %v443_v11, %v443_v11  ;;  %v905_v18 = vcombine.high %v536_v12, %v536_v12  ;;  %v629_v21 = vld [vmem:[%s1302_s26 + $0x18] sm:$0xff]  ;;  %v904_v31 = vcombine.low %v536_v12, %v536_v12  ;;  %vm371_vm4 = vcmask 64512   ;;  %s892_s9 = sshll.u32 %s1298_s22, 6  ;;  %s918_s11 = sshll.u32 %s1144_s18, 10 }
  0x3e   : > { %s893_s12 = sshll.u32 %s252_s10, 2  ;;  %898 = vmatprep.subr.msk.bf16.mxu1 %vm375_vm3, %v897_v13  ;;  %902 = vmatprep.subr.msk.bf16.mxu0 %vm375_vm3, %v901_v14  ;;  %v377_v19 = vsel %vm375_vm3, %v896_v15, 0  ;;  %v909_v22 = vcombine.high %v629_v21, %v629_v21  ;;  %v908_v33 = vcombine.low %v629_v21, %v629_v21  ;;  %s250_s21 = scalar_lea.vmem [#allocation5], %s892_s9 }
  0x3f   : > { %s257_s6 = scalar_lea.vmem %s1426_s0, %s893_s12  ;;  %v469_v20 = vsel %vm375_vm3, %v900_v16, 0  ;;  %383 = vmatpush1.bf16.msra.mxu1 %v377_v19  ;;  %v562_v32 = vsel %vm375_vm3, %v904_v31, 0  ;;  %s787_s24 = sshll.u32 %s250_s21, 4  ;;  %s1379_s24 = int_to_ptr.vmem [resolvable:$true] %s787_s24 }
  0x40   : > { %v259_v3 = vld [vmem:[%s257_s6] sm:$0xf]  ;;  %906 = vmatprep.subr.msk.bf16.mxu1 %vm375_vm3, %v905_v18  ;;  %v655_v35 = vsel %vm375_vm3, %v908_v33, 0  ;;  %s1377_s10 = scalar_lea.hbm %s1430_s4, %s918_s11  ;;  %s771_s18 = scalar_lea.sflag [#allocation4], %s1298_s22 }
  0x41   : > { %924 = vmatmul.mubr.msk.bf16.vlgmr.msra.gmra.mrb[0].mxu0 %vm268_vm2, %v259_v3  ;;  %s1070_s12 = scalar_lea.vmem %s1379_s24, 1024  ;;  %p1438_p11 = scmp.ne.s32.totalorder %s1434_s28, 0 }
  0x42   : > { %506 = vmatprep.mubr.bf16.mxu0 %v1159_v17  ;;  %475 = vmatpush1.bf16.msra.mxu0 %v469_v20  ;;  %p1071_p8 = scmp.ne.s32.totalorder %s1379_s24, %s1070_s12  ;;  %s1160_s13 = smov [#allocation5]  }
  0x43   : > { %910 = vmatprep.subr.msk.bf16.mxu0 %vm375_vm3, %v909_v22  ;;  %s1074_s14 = sshll.u32 %s1160_s13, 4  ;;  %s1075_s14 = int_to_ptr.vmem [resolvable:$false] %s1074_s14 }
  0x44   : > { %p1072_p0 = pnand %p1071_p8, %p1438_p11  ;;  %s1076_s6 = scalar_lea.vmem %s1075_s14, 2048 }
  0x45   : > { %p1077_p13 = scmp.lt.s32.totalorder %s1379_s24, %s1075_s14  ;;  %p1078_p2 = scmp.lt.s32.totalorder %s1076_s6, %s1070_s12 }
  0x46   : > { %p1073_p6 = pneg %p1072_p0 }
  0x47   : > { %p1079_p5 = por %p1078_p2, %p1077_p13 }
  0x49   : > { %p1080_p4 = pnand %p1079_p5, %p1073_p6 }
 0x114   : > { %v310_v5 = vpop.f32.mrb[0].mxu0 }
 0x115   : > { %v925_v6 = vpop.f32.mrb[1].mxu0  ;;  %v311_v7 = vadd.f32 %v894_v4, %v310_v5 }
 0x116   : > { %v313_v8 = vpop.f32.mrb[2].mxu0 }
 0x117   : > { %316 = vxpose.xlu0.b32.start.end [1/1] (short) (narrow) %v311_v7, 32  ;;  %v926_v9 = vpop.f32.mrb[3].mxu0 }
 0x197   : > { %v332_v23 = vpop.trf.xlu0 }
 0x198   : > { %v348_v24 = vpack.c.bf16 %v332_v23, %v332_v23 }
 0x19a   : > { %350 = vxpose.xlu0.c.b16.start.end [1/1] (short) (narrow) %v348_v24, 16 }
 0x19b   : > { %v333_v25 = vpop.trf.xlu0 }
 0x19c   : > { %v442_v26 = vpack.c.bf16 %v333_v25, %v333_v25 }
 0x19e   : > { %444 = vxpose.xlu1.c.b16.start.end [1/1] (short) (narrow) %v442_v26, 16 }
 0x19f   : > { %v334_v27 = vpop.trf.xlu0 }
 0x1a0   : > { %v535_v28 = vpack.c.bf16 %v334_v27, %v334_v27 }
 0x1a2   : > { %537 = vxpose.xlu1.c.b16.start.end [1/1] (short) (narrow) %v535_v28, 16 }
 0x1a3   : > { %v335_v29 = vpop.trf.xlu0 }
 0x1a4   : > { %v628_v30 = vpack.c.bf16 %v335_v29, %v335_v29 }
 0x1a6   : > { %630 = vxpose.xlu1.c.b16.start.end [1/1] (short) (narrow) %v628_v30, 16 }
 0x200   : > { %v358_v34 = vpop.trf.xlu0 }
 0x201   : > { %899 = vmatmul.mubr.msk.bf16.vlgmr.msra.gmra.mrb[0].mxu1 %vm371_vm4, %v358_v34 }
 0x202   : > { %568 = vmatpush1.bf16.msra.mxu1 %v562_v32  ;;  %599 = vmatprep.mubr.bf16.mxu1 %v1159_v17 }
 0x204   : > { %v452_v36 = vpop.trf.xlu1 }
 0x205   : > { %903 = vmatmul.mubr.msk.bf16.vlgmr.msra.gmra.mrb[4].mxu0 %vm371_vm4, %v452_v36 }
 0x206   : > { %661 = vmatpush1.bf16.msra.mxu0 %v655_v35  ;;  %692 = vmatprep.mubr.bf16.mxu0 %v1159_v17 }
 0x208   : > { %v545_v37 = vpop.trf.xlu1 }
 0x209   : > { %907 = vmatmul.mubr.msk.bf16.vlgmr.msra.gmra.mrb[4].mxu1 %vm371_vm4, %v545_v37 }
 0x20c   : > { %v638_v38 = vpop.trf.xlu1 }
 0x20d   : > { %911 = vmatmul.mubr.msk.bf16.vlgmr.msra.gmra.mrb[8].mxu0 %vm371_vm4, %v638_v38 }
 0x2d4   : > { %v1331_v39 = vpop.f32.mrb[0].mxu1 }
 0x2d5   : > { %v1333_v40 = vpop.f32.mrb[1].mxu1 }
 0x2d6   : > { %v420_v41 = vpop.f32.mrb[2].mxu1  ;;  %v425_v42 = vmax.f32 %v1331_v39, %v1333_v40 }
 0x2d7   : > { %v421_v43 = vpop.f32.mrb[3].mxu1 }
 0x2d8   : > { %426 = vmax.xlane.f32.xlu1 %v425_v42  ;;  %v1337_v44 = vpop.f32.mrb[4].mxu0 }
 0x2d9   : > { %v1339_v45 = vpop.f32.mrb[5].mxu0 }
 0x2da   : > { %v512_v46 = vpop.f32.mrb[6].mxu0  ;;  %v517_v47 = vmax.f32 %v1337_v44, %v1339_v45 }
 0x2db   : > { %v513_v48 = vpop.f32.mrb[7].mxu0 }
 0x2dc   : > { %v1343_v49 = vpop.f32.mrb[4].mxu1  ;;  %518 = vmax.xlane.f32.xlu1 %v517_v47 }
 0x2dd   : > { %v1345_v50 = vpop.f32.mrb[5].mxu1 }
 0x2de   : > { %v605_v51 = vpop.f32.mrb[6].mxu1  ;;  %v610_v52 = vmax.f32 %v1343_v49, %v1345_v50 }
 0x2df   : > { %v606_v53 = vpop.f32.mrb[7].mxu1 }
 0x2e0   : > { %611 = vmax.xlane.f32.xlu1 %v610_v52  ;;  %v694_v54 = vpop.f32.mrb[8].mxu0 }
 0x2e1   : > { %v696_v55 = vpop.f32.mrb[9].mxu0 }
 0x2e2   : > { %v698_v56 = vpop.f32.mrb[10].mxu0  ;;  %v703_v57 = vmax.f32 %v694_v54, %v696_v55 }
 0x2e3   : > { %v699_v58 = vpop.f32.mrb[11].mxu0 }
 0x2e4   : > { %704 = vmax.xlane.f32.xlu1 %v703_v57 }
 0x365   : > { %v427_v59 = vpop.xlane.xlu1 %426 }
 0x366   : > { %v428_v60 = vsub.f32 %v1331_v39, %v427_v59  ;;  %v429_v61 = vsub.f32 %v1333_v40, %v427_v59 }
 0x368   : > { %v430_v62 = vmul.f32 1.442695, %v428_v60  ;;  %v432_v63 = vmul.f32 1.442695, %v429_v61 }
 0x369   : > { %v519_v0 = vpop.xlane.xlu1 %518 }
 0x36a   : > { %1002 = vpow2.f32 %v430_v62  ;;  %v520_v1 = vmax.f32 %v427_v59, %v519_v0 }
 0x36b   : > { %1004 = vpow2.f32 %v432_v63 }
 0x36c   : > { %v521_v2 = vsub.f32 %v1337_v44, %v520_v1  ;;  %v522_v3 = vsub.f32 %v1339_v45, %v520_v1  ;;  %v530_v4 = vsub.f32 %v427_v59, %v520_v1 }
 0x36d   : > { %v612_v5 = vpop.xlane.xlu1 %611 }
 0x36e   : > { %v613_v6 = vmax.f32 %v520_v1, %v612_v5  ;;  %v523_v7 = vmul.f32 1.442695, %v521_v2  ;;  %v525_v8 = vmul.f32 1.442695, %v522_v3  ;;  %v531_v41 = vmul.f32 1.442695, %v530_v4 }
 0x370   : > { %v614_v9 = vsub.f32 %v1343_v49, %v613_v6  ;;  %v615_v10 = vsub.f32 %v1345_v50, %v613_v6  ;;  %v623_v11 = vsub.f32 %v520_v1, %v613_v6  ;;  %1006 = vpow2.f32 %v523_v7 }
 0x371   : > { %v705_v12 = vpop.xlane.xlu1 %704  ;;  %1008 = vpow2.f32 %v525_v8 }
 0x372   : > { %v1355_v13 = vmax.f32 %v613_v6, %v705_v12  ;;  %v616_v14 = vmul.f32 1.442695, %v614_v9  ;;  %v618_v15 = vmul.f32 1.442695, %v615_v10  ;;  %v624_v42 = vmul.f32 1.442695, %v623_v11 }
 0x374   : > { %v1003_v16 = vpop.eup %1002  ;;  %1010 = vpow2.f32 %v616_v14  ;;  %v707_v17 = vsub.f32 %v694_v54, %v1355_v13  ;;  %v708_v18 = vsub.f32 %v696_v55, %v1355_v13  ;;  %v716_v19 = vsub.f32 %v613_v6, %v1355_v13 }
 0x375   : > { %v1005_v20 = vpop.eup %1004  ;;  %1012 = vpow2.f32 %v618_v15  ;;  %v724_v21 = vsub.f32 %v1331_v39, %v1355_v13  ;;  %v725_v22 = vsub.f32 %v1333_v40, %v1355_v13  ;;  %v736_v23 = vsub.f32 %v1337_v44, %v1355_v13 }
 0x376   : > { %v434_v24 = vadd.f32 %v1005_v20, %v1003_v16  ;;  %v709_v25 = vmul.f32 1.442695, %v707_v17  ;;  %v711_v26 = vmul.f32 1.442695, %v708_v18  ;;  %v737_v27 = vsub.f32 %v1339_v45, %v1355_v13 }
 0x377   : > { %v748_v28 = vsub.f32 %v1343_v49, %v1355_v13  ;;  %v749_v29 = vsub.f32 %v1345_v50, %v1355_v13  ;;  %v437_v39 = vsub.f32 -inf, %v427_v59  ;;  %v717_v44 = vmul.f32 1.442695, %v716_v19 }
 0x378   : > { %435 = vadd.xlane.f32.xlu1 %v434_v24  ;;  %1014 = vpow2.f32 %v709_v25  ;;  %v726_v53 = vmul.f32 1.442695, %v724_v21  ;;  %v728_v55 = vmul.f32 1.442695, %v725_v22  ;;  %v738_v57 = vmul.f32 1.442695, %v736_v23 }
 0x379   : > { %1016 = vpow2.f32 %v711_v26  ;;  %v438_v40 = vmul.f32 1.442695, %v437_v39  ;;  %v740_v59 = vmul.f32 1.442695, %v737_v27  ;;  %v750_v61 = vmul.f32 1.442695, %v748_v28 }
 0x37a   : > { %v1007_v30 = vpop.eup %1006  ;;  %v752_v0 = vmul.f32 1.442695, %v749_v29 }
 0x37b   : > { %v1009_v31 = vpop.eup %1008  ;;  %1018 = vpow2.f32 %v438_v40 }
 0x37c   : > { %v527_v32 = vadd.f32 %v1009_v31, %v1007_v30  ;;  %1020 = vpow2.f32 %v531_v41 }
 0x37d   : > { %1022 = vpow2.f32 %v624_v42 }
 0x37e   : > { %v1011_v33 = vpop.eup %1010  ;;  %528 = vadd.xlane.f32.xlu1 %v527_v32  ;;  %1024 = vpow2.f32 %v717_v44 }
 0x37f   : > { %v1013_v34 = vpop.eup %1012  ;;  %1026 = vpow2.f32 %v726_v53 }
 0x380   : > { %v620_v35 = vadd.f32 %v1013_v34, %v1011_v33  ;;  %1028 = vpow2.f32 %v728_v55 }
 0x381   : > { %1030 = vpow2.f32 %v738_v57 }
 0x382   : > { %v1015_v36 = vpop.eup %1014  ;;  %621 = vadd.xlane.f32.xlu1 %v620_v35  ;;  %1032 = vpow2.f32 %v740_v59 }
 0x383   : > { %v1017_v37 = vpop.eup %1016  ;;  %1034 = vpow2.f32 %v750_v61 }
 0x384   : > { %v713_v38 = vadd.f32 %v1017_v37, %v1015_v36 }
 0x385   : > { %v1019_v43 = vpop.eup %1018 }
 0x386   : > { %714 = vadd.xlane.f32.xlu1 %v713_v38  ;;  %v440_v45 = vmul.f32 0.0, %v1019_v43  ;;  %v1021_v48 = vpop.eup %1020 }
 0x387   : > { %v1023_v52 = vpop.eup %1022 }
 0x388   : > { %v1025_v60 = vpop.eup %1024 }
 0x389   : > { %v1027_v2 = vpop.eup %1026 }
 0x38a   : > { %v1029_v3 = vpop.eup %1028 }
 0x38b   : > { %v1031_v4 = vpop.eup %1030 }
 0x38c   : > { %v1033_v5 = vpop.eup %1032 }
 0x38d   : > { %v1035_v6 = vpop.eup %1034 }
 0x405   : > { %v436_v46 = vpop.xlane.xlu1 %435 }
 0x406   : > { %v441_v47 = vadd.f32 %v440_v45, %v436_v46 }
 0x408   : > { %v533_v49 = vmul.f32 %v1021_v48, %v441_v47 }
 0x40b   : > { %v529_v50 = vpop.xlane.xlu1 %528 }
 0x40c   : > { %v534_v51 = vadd.f32 %v533_v49, %v529_v50 }
 0x40e   : > { %v626_v54 = vmul.f32 %v1023_v52, %v534_v51 }
 0x40f   : > { %v622_v56 = vpop.xlane.xlu1 %621 }
 0x410   : > { %v627_v58 = vadd.f32 %v626_v54, %v622_v56 }
 0x412   : > { %v719_v62 = vmul.f32 %v1025_v60, %v627_v58 }
 0x413   : > { %v715_v63 = vpop.xlane.xlu1 %714 }
 0x414   : > { %v720_v1 = vadd.f32 %v719_v62, %v715_v63 }
 0x416   : > { %1036 = vrcp.f32 %v720_v1 }
 0x417   : > { %1038 = vpow2.f32 %v752_v0 }
 0x420   : > { %v1037_v7 = vpop.eup %1036 }
 0x421   : > { %v1039_v8 = vpop.eup %1038  ;;  %v730_v9 = vmul.f32 %v1037_v7, %v1027_v2  ;;  %v731_v10 = vmul.f32 %v1037_v7, %v1029_v3  ;;  %v742_v11 = vmul.f32 %v1037_v7, %v1031_v4  ;;  %v743_v12 = vmul.f32 %v1037_v7, %v1033_v5 }
 0x422   : > { %v754_v13 = vmul.f32 %v1037_v7, %v1035_v6  ;;  %v755_v14 = vmul.f32 %v1039_v8, %v1037_v7  ;;  %v766_v15 = vmul.f32 %v1037_v7, %v1015_v36  ;;  %v767_v16 = vmul.f32 %v1037_v7, %v1017_v37 }
 0x423   : > { %732 = vst [vmem:[%s250_s21] sm:$0xff] %v730_v9  ;;  %733 = vst [vmem:[%s250_s21 + $0x8] sm:$0xff] %v731_v10 }
 0x424   : > { %744 = vst [vmem:[%s250_s21 + $0x10] sm:$0xff] %v742_v11  ;;  %745 = vst [vmem:[%s250_s21 + $0x18] sm:$0xff] %v743_v12 }
 0x425   : > { %756 = vst [vmem:[%s250_s21 + $0x20] sm:$0xff] %v754_v13  ;;  %757 = vst [vmem:[%s250_s21 + $0x28] sm:$0xff] %v755_v14 }
 0x426   : > { %768 = vst [vmem:[%s250_s21 + $0x30] sm:$0xff] %v766_v15  ;;  %769 = vst [vmem:[%s250_s21 + $0x38] sm:$0xff] %v767_v16 }
 0x427   : > { %1083 = shalt.err (!%p1080_p4)
}
 0x428   : > { %s1084_s22 = scalar_lea.hbm %s1377_s10, 1024  ;;  %s1088_s27 = scalar_lea.hbm %s1430_s4, 2048 }
 0x429   : > { %p1085_p7 = scmp.ne.s32.totalorder %s1377_s10, %s1084_s22  ;;  %p1089_p1 = scmp.lt.u32.totalorder %s1377_s10, %s1430_s4 }
 0x42a   : > { %p1090_p3 = scmp.lt.u32.totalorder %s1088_s27, %s1084_s22  ;;  %p1092_p8 = scmp.lt.u32.totalorder %s1084_s22, %s1377_s10 }
 0x42b   : > { %p1086_p10 = pnand %p1085_p7, %p1438_p11 }
 0x42c   : > { %p1091_p9 = por %p1090_p3, %p1089_p1 }
 0x42d   : > { %p1087_p12 = pneg %p1086_p10 }
 0x42e   : > { %p1093_p0 = por %p1092_p8, %p1091_p9 }
 0x430   : > { %p1094_p6 = pnand %p1093_p0, %p1087_p12 }
 0x432   : > { %1097 = shalt.err (!%p1094_p6)
}
 0x433   : > { %929 = dma.vmem_to_hbm [thread:$0]  (%p1438_p11), %s1379_s24, 1024, %s1377_s10, %s771_s18  }
 0x434 PF: > { %s799_s11 = sand.u32 1, %s1132_s15   ;;  %p1439_p13 = scmp.ne.s32.totalorder %s1435_s30, 0 }
 0x435   : > { %p1440_p2 = scmp.ge.s32.totalorder %s1152_s20, 2  ;;  %s800_s21 = scalar_lea.sflag [#allocation4], %s799_s11 }
 0x437   : > { %p936_p5 = pnand %p1440_p2, %p1439_p13 }
 0x439   : > { %1127 = dma.done.wait (!%p936_p5), %s800_s21, 1024  }
 0x43a   : > { %1129 = vsyncadd (!%p936_p5), %s800_s21, 4294966272  ;;  %s20_s20 = sadd.s32 1, %s1152_s20   ;;  %s1441_s15 = smov %s1136_s16 }
 0x43b   : > { %p17_p4 = scmp.ge.s32.totalorder %s20_s20, 4   ;;  %s1442_s16 = smov %s1140_s17 }
 0x43c   : > { %s1443_s17 = smov %s1242_s29  ;;  %s1444_s18 = smov %s1148_s19 }
 0x43d   : > { %s1445_s19 = smov %s1447_s23  ;;  %19 = sbr.rel (!%p17_p4) target bundleno = 6 (0x6), region = 84 }
 0x444   :  { %805 = vsyncpa [#allocation3], 1 }
 0x445   :  { %807 = vsyncpa [#allocation3 + $0x1], 1 }
 0x446   :  { %808 = vsyncpa [#allocation4], 1 }
 0x447   :  { %810 = vsyncpa [#allocation4 + $0x1], 1 }

</bundles_post_ra>
